<compile_context>
chip_gen: v7x
topology: tpu7x:2x2x1
jax: 0.10.0
libtpu: 0.0.40
codegen_flags: <defaults>
</compile_context>

<pallas_src>
import functools

import jax
import jax.numpy as jnp
from jax.experimental import pallas as pl
from jax.experimental.pallas import tpu as pltpu

LANES = 128
SUBLANES = 8
VREG_ELEMS = SUBLANES * LANES      # 1024 elements per (8,128) f32 vreg
CHUNK_ROWS = 512                   # (512,128) f32 chunk = 256 KiB per operand


@functools.lru_cache(maxsize=1)
def _device_config():
    """Returns (num_slices, max_block_rows, vmem_limit_bytes) for the local TPU."""
    try:
        kind = jax.devices()[0].device_kind.lower()
    except Exception:  # pragma: no cover - defensive
        kind = ""
    if "v7" in kind:
        # 2 TensorCores; VMEM is 64 MiB per TC (32 MiB scoped default).
        return 2, 8192, 32 * 1024 * 1024
    if "v6" in kind or "v5" in kind:
        # Single TC; 128 MiB physical VMEM — raise the scoped limit past the
        # v5e 16 MiB default so the double-buffered 8192-row blocks fit.
        return 1, 8192, 48 * 1024 * 1024
    # Unknown chip: conservative defaults.
    return 1, 4096, None


def _bce_terms(p, t):
    """Per-element clamped BCE (matches torch.nn.BCELoss: log clamped at -100)."""
    p = p.astype(jnp.float32)
    t = t.astype(jnp.float32)
    log_p = jnp.maximum(jnp.log(p), -100.0)
    log_1mp = jnp.maximum(jnp.log(1.0 - p), -100.0)
    # -(t*log_p + (1-t)*log_1mp) == -(log_1mp + t*(log_p - log_1mp))
    return -(log_1mp + t * (log_p - log_1mp))


def _bce_partial_kernel(p_ref, t_ref, o_ref, *, rows, block_rows, steps,
                        num_blocks, chunk_rows, last_partial):
    c = pl.program_id(0)           # megacore slice ("parallel")
    i = pl.program_id(1)           # row-block within the slice ("arbitrary")
    blk = c * steps + i            # logical row-block index

    @pl.when(i == 0)
    def _init():
        o_ref[...] = jnp.zeros_like(o_ref)

    def fold(x, nrows):
        # (nrows,128) -> (8,128): tile-aligned reshape, VPU adds only.
        return x.reshape(nrows // SUBLANES, SUBLANES, LANES).sum(axis=0)

    def block_sum(masked):
        row0 = blk * block_rows

        def chunk(r0, nrows):
            pe = _bce_terms(p_ref[pl.ds(r0, nrows), :],
                            t_ref[pl.ds(r0, nrows), :])
            if masked:
                # Single select on per_elem (after the logs); only on the last
                # real block, never on the steady-state fast path.
                local = jax.lax.broadcasted_iota(jnp.int32, (nrows, LANES), 0)
                pe = jnp.where(row0 + r0 + local < rows, pe, 0.0)
            return fold(pe, nrows)

        n_full = block_rows // chunk_rows
        rem = block_rows - n_full * chunk_rows
        acc = jnp.zeros((SUBLANES, LANES), jnp.float32)
        if n_full == 1:
            acc = chunk(0, chunk_rows)
        elif n_full > 1:
            def body(j, a):
                r0 = pl.multiple_of(j * chunk_rows, chunk_rows)
                return a + chunk(r0, chunk_rows)
            acc = jax.lax.fori_loop(0, n_full, body, acc)
        if rem:
            acc = acc + chunk(n_full * chunk_rows, rem)
        return acc

    if last_partial:
        # Fast path: interior blocks are fully valid -> no mask work at all.
        @pl.when(blk < num_blocks - 1)
        def _fast():
            o_ref[...] += block_sum(masked=False)

        # Last real block: mask the Pallas-padded tail rows once, on per_elem.
        @pl.when(blk == num_blocks - 1)
        def _last():
            o_ref[...] += block_sum(masked=True)
    else:
        # Every real block is fully valid; only skip the (rare) clamped
        # duplicate block of the short megacore slice (blk >= num_blocks).
        @pl.when(blk < num_blocks)
        def _all():
            o_ref[...] += block_sum(masked=False)


@jax.jit
def bce_loss(predictions: jax.Array, targets: jax.Array) -> jax.Array:
    """Mean-reduced binary cross entropy (== torch.nn.BCELoss()(p, t))."""
    assert predictions.shape == targets.shape
    n = predictions.size
    num_slices, max_block_rows, vmem_limit = _device_config()

    p_flat = predictions.reshape(-1)
    t_flat = targets.reshape(-1)

    # Stream the vreg-aligned prefix through the kernel; the <1024-element
    # ragged tail (if any) is summed in plain JAX — no full-array pad copies.
    n_main = (n // VREG_ELEMS) * VREG_ELEMS
    total = jnp.float32(0.0)

    if n_main:
        rows = n_main // LANES                          # multiple of 8
        p2 = (p_flat if n_main == n else p_flat[:n_main]).reshape(rows, LANES)
        t2 = (t_flat if n_main == n else t_flat[:n_main]).reshape(rows, LANES)

        block_rows = min(max_block_rows, rows)
        num_blocks = pl.cdiv(rows, block_rows)
        steps = pl.cdiv(num_blocks, num_slices)
        chunk_rows = min(CHUNK_ROWS, block_rows)
        last_partial = (num_blocks * block_rows != rows)

        def in_map(c, i):
            # Clamp so the out-of-range logical block of the short slice (odd
            # block count on v7x) re-reads a valid block; its compute is
            # skipped inside the kernel.
            return (jnp.minimum(c * steps + i, num_blocks - 1), 0)

        in_spec = pl.BlockSpec((block_rows, LANES), in_map)

        kernel = functools.partial(
            _bce_partial_kernel, rows=rows, block_rows=block_rows, steps=steps,
            num_blocks=num_blocks, chunk_rows=chunk_rows,
            last_partial=last_partial)

        compiler_kwargs = dict(dimension_semantics=("parallel", "arbitrary"))
        if vmem_limit is not None:
            compiler_kwargs["vmem_limit_bytes"] = vmem_limit

        in_bytes = p2.size * p2.dtype.itemsize + t2.size * t2.dtype.itemsize
        out_rows = num_slices * SUBLANES

        partials = pl.pallas_call(
            kernel,
            out_shape=jax.ShapeDtypeStruct((out_rows, LANES), jnp.float32),
            grid=(num_slices, steps),
            in_specs=[in_spec, in_spec],
            out_specs=pl.BlockSpec((SUBLANES, LANES), lambda c, i: (c, 0)),
            compiler_params=pltpu.CompilerParams(**compiler_kwargs),
            cost_estimate=pl.CostEstimate(
                flops=8 * n_main,
                transcendentals=2 * n_main,
                bytes_accessed=in_bytes + out_rows * LANES * 4),
        )(p2, t2)
        total = total + jnp.sum(partials)

    if n_main < n:
        # Ragged <1024-element tail: tiny pure-JAX clamped-BCE sum.
        total = total + jnp.sum(_bce_terms(p_flat[n_main:], t_flat[n_main:]))

    return (total / jnp.float32(n)).astype(jnp.float32)


class ExperimentalLoss2:
    """JAX port of the PyTorch ExperimentalLoss2 module (BCELoss wrapper)."""

    def __init__(self, dataset=None):
        self.loss = bce_loss
        self.current_loss = 0.0
        self.dataset = dataset  # unused in forward, kept for API parity

    def __call__(self, predictions: jax.Array, targets: jax.Array) -> jax.Array:
        self.current_loss = self.loss(predictions, targets)
        return self.current_loss

    def latest_loss_to_tqdm(self) -> str:
        return f"BCE-loss: {float(self.current_loss):.5f}"


def _bce_ref(p, t):
    p = p.astype(jnp.float32)
    t = t.astype(jnp.float32)
    log_p = jnp.maximum(jnp.log(p), -100.0)
    log_1mp = jnp.maximum(jnp.log(1.0 - p), -100.0)
    return jnp.mean(-(t * log_p + (1.0 - t) * log_1mp))


if __name__ == "__main__":
    key = jax.random.PRNGKey(0)

    def make_inputs(k, shape, dtype=jnp.float32):
        kp, kt = jax.random.split(k)
        p = jax.nn.sigmoid(jax.random.normal(kp, shape, jnp.float32)).astype(dtype)
        t = jax.random.bernoulli(kt, 0.5, shape).astype(dtype)
        return p, t

    k0, k1, k2, k3, k4 = jax.random.split(key, 5)

    # Primary case consistent with the module's usage (NCHW probability maps).
    predictions, targets = make_inputs(k0, (2, 4, 16, 16))
    loss_mod = ExperimentalLoss2()
    loss = loss_mod(predictions, targets)
    jax.block_until_ready(loss)
    assert jnp.allclose(loss, _bce_ref(predictions, targets), rtol=1e-5, atol=1e-5)

    # Non-1024-divisible size: exercises the pure-JAX ragged-tail path.
    p_b, t_b = make_inputs(k1, (2, 3, 20, 20))
    assert jnp.allclose(bce_loss(p_b, t_b), _bce_ref(p_b, t_b), rtol=1e-5, atol=1e-5)

    # Multi-block path with a partially valid final block (masked last block,
    # fast unmasked interior blocks, odd/even slice split on v7x).
    p_c, t_c = make_inputs(k2, (3, 8, 256, 256))
    assert jnp.allclose(bce_loss(p_c, t_c), _bce_ref(p_c, t_c), rtol=5e-5, atol=1e-5)

    # Saturated probabilities hit the -100 log clamp exactly like PyTorch.
    p_d, t_d = make_inputs(k3, (1, 1, 8, 128))
    p_d = p_d.at[0, 0, 0, 0].set(0.0).at[0, 0, 0, 1].set(1.0)
    t_d = t_d.at[0, 0, 0, 0].set(1.0).at[0, 0, 0, 1].set(0.0)
    assert jnp.allclose(bce_loss(p_d, t_d), _bce_ref(p_d, t_d), rtol=1e-5, atol=1e-5)

    # Native bf16 streaming (kernel widens per tile; halves HBM traffic).
    p_e, t_e = make_inputs(k4, (2, 4, 32, 32), dtype=jnp.bfloat16)
    assert jnp.allclose(bce_loss(p_e, t_e), _bce_ref(p_e, t_e), rtol=1e-4, atol=1e-4)

    print("KERNEL_OK")
</pallas_src>

<mosaic_0001>
module attributes {stable_mosaic.version = 11 : i64} {
  func.func @_bce_partial_kernel(%arg0: i32, %arg1: i32, %arg2: memref<16x128xf32, #tpu.memory_space<vmem>>, %arg3: memref<16x128xf32, #tpu.memory_space<vmem>>, %arg4: memref<8x128xf32, #tpu.memory_space<vmem>>) attributes {dimension_semantics = [#tpu.dimension_semantics<parallel>, #tpu.dimension_semantics<arbitrary>], iteration_bounds = array<i64: 1, 1>, scalar_prefetch = 0 : i64, scratch_operands = 0 : i64, tpu.core_type = #tpu.core_type<tc>, window_params = [{transform_indices = @transform_0, window_bounds = array<i64: 16, 128>}, {transform_indices = @transform_1, window_bounds = array<i64: 16, 128>}, {transform_indices = @transform_2, window_bounds = array<i64: 8, 128>}]} {
    %c1_i32 = arith.constant 1 : i32
    %0 = arith.muli %arg0, %c1_i32 : i32
    %1 = arith.addi %0, %arg1 : i32
    %c0_i32 = arith.constant 0 : i32
    %2 = arith.cmpi eq, %arg1, %c0_i32 : i32
    %3 = arith.extui %2 : i1 to i32
    %c0_i32_0 = arith.constant 0 : i32
    %4 = arith.cmpi ne, %3, %c0_i32_0 : i32
    scf.if %4 {
      %cst = arith.constant 0.000000e+00 : f32
      %8 = vector.broadcast %cst : f32 to vector<8x128xf32>
      %c0 = arith.constant 0 : index
      %c0_3 = arith.constant 0 : index
      %9 = vector.load %arg4[%c0, %c0_3] : memref<8x128xf32, #tpu.memory_space<vmem>>, vector<8x128xf32>
      tpu.vector_store %arg4[%c0, %c0_3], %8 {strides = array<i32>} : memref<8x128xf32, #tpu.memory_space<vmem>>, vector<8x128xf32>,
    } else {
    }
    %c1_i32_1 = arith.constant 1 : i32
    %5 = arith.cmpi slt, %1, %c1_i32_1 : i32
    %6 = arith.extui %5 : i1 to i32
    %c0_i32_2 = arith.constant 0 : i32
    %7 = arith.cmpi ne, %6, %c0_i32_2 : i32
    scf.if %7 {
      %c0 = arith.constant 0 : index
      %c0_3 = arith.constant 0 : index
      %8 = vector.load %arg4[%c0, %c0_3] : memref<8x128xf32, #tpu.memory_space<vmem>>, vector<8x128xf32>
      %c0_4 = arith.constant 0 : index
      %c0_5 = arith.constant 0 : index
      %9 = vector.load %arg2[%c0_4, %c0_5] : memref<16x128xf32, #tpu.memory_space<vmem>>, vector<16x128xf32>
      %c0_6 = arith.constant 0 : index
      %c0_7 = arith.constant 0 : index
      %10 = vector.load %arg3[%c0_6, %c0_7] : memref<16x128xf32, #tpu.memory_space<vmem>>, vector<16x128xf32>
      %11 = math.log %9 : vector<16x128xf32>
      %cst = arith.constant -1.000000e+02 : f32
      %12 = vector.broadcast %cst : f32 to vector<16x128xf32>
      %13 = arith.maximumf %11, %12 : vector<16x128xf32>
      %cst_8 = arith.constant 1.000000e+00 : f32
      %14 = vector.broadcast %cst_8 : f32 to vector<16x128xf32>
      %15 = arith.subf %14, %9 : vector<16x128xf32>
      %16 = math.log %15 : vector<16x128xf32>
      %cst_9 = arith.constant -1.000000e+02 : f32
      %17 = vector.broadcast %cst_9 : f32 to vector<16x128xf32>
      %18 = arith.maximumf %16, %17 : vector<16x128xf32>
      %19 = arith.subf %13, %18 : vector<16x128xf32>
      %20 = arith.mulf %10, %19 : vector<16x128xf32>
      %21 = arith.addf %18, %20 : vector<16x128xf32>
      %cst_10 = arith.constant 0.000000e+00 : f32
      %22 = vector.broadcast %cst_10 : f32 to vector<16x128xf32>
      %23 = arith.subf %22, %21 : vector<16x128xf32>
      %24 = vector.shape_cast %23 : vector<16x128xf32> to vector<2x8x128xf32>
      %cst_11 = arith.constant dense<0.000000e+00> : vector<8x128xf32>
      %25 = vector.multi_reduction <add>, %24, %cst_11 [0] : vector<2x8x128xf32> to vector<8x128xf32>
      %26 = arith.addf %8, %25 : vector<8x128xf32>
      %c0_12 = arith.constant 0 : index
      %c0_13 = arith.constant 0 : index
      %27 = vector.load %arg4[%c0_12, %c0_13] : memref<8x128xf32, #tpu.memory_space<vmem>>, vector<8x128xf32>
      tpu.vector_store %arg4[%c0_12, %c0_13], %26 {strides = array<i32>} : memref<8x128xf32, #tpu.memory_space<vmem>>, vector<8x128xf32>,
    } else {
    }
    return
  }
  func.func @transform_0(%arg0: i32, %arg1: i32) -> (i32, i32) {
    %c1_i32 = arith.constant 1 : i32
    %0 = arith.muli %arg0, %c1_i32 : i32
    %1 = arith.addi %0, %arg1 : i32
    %c0_i32 = arith.constant 0 : i32
    %2 = arith.minsi %1, %c0_i32 : i32
    %c0_i32_0 = arith.constant 0 : i32
    %c0_i32_1 = arith.constant 0 : i32
    return %2, %c0_i32_0 : i32, i32
  }
  func.func @transform_1(%arg0: i32, %arg1: i32) -> (i32, i32) {
    %c1_i32 = arith.constant 1 : i32
    %0 = arith.muli %arg0, %c1_i32 : i32
    %1 = arith.addi %0, %arg1 : i32
    %c0_i32 = arith.constant 0 : i32
    %2 = arith.minsi %1, %c0_i32 : i32
    %c0_i32_0 = arith.constant 0 : i32
    %c0_i32_1 = arith.constant 0 : i32
    return %2, %c0_i32_0 : i32, i32
  }
  func.func @transform_2(%arg0: i32, %arg1: i32) -> (i32, i32) {
    %c0_i32 = arith.constant 0 : i32
    %c0_i32_0 = arith.constant 0 : i32
    return %arg0, %c0_i32 : i32, i32
  }
}

</mosaic_0001>

<bundles_post_ra>
// kernel: bce_loss.1
= control target key start
LH: loop header
LB: loop body
LE: loop exit
PB: predicated region body
PF: predicated region fallthrough
CT: control target
= control target key end

     0   :  { %s170_s0 = inlined_call_operand.vmem [shape: f32[16,128], index: 0, kind: input, shape index: {}]   ;;  %s171_s1 = inlined_call_operand.vmem [shape: f32[16,128], index: 1, kind: input, shape index: {}]   ;;  %s172_s2 = inlined_call_operand.vmem [shape: f32[8,128], index: 2, kind: output, shape index: {}]  }
   0x1   :  { %v86_v0 = vld [vmem:[%s170_s0] sm:$0xff]  ;;  %v87_v1 = vld [vmem:[%s170_s0 + $0x8] sm:$0xff] }
   0x2   :  { %132 = vlog2.f32 %v86_v0  ;;  %v96_v2 = vsub.f32 1.0, %v86_v0  ;;  %v97_v3 = vsub.f32 1.0, %v87_v1  ;;  %v88_v15 = vld [vmem:[%s171_s1] sm:$0xff]  ;;  %v89_v17 = vld [vmem:[%s171_s1 + $0x8] sm:$0xff] }
   0x3   :  { %134 = vlog2.f32 %v87_v1 }
   0x4   :  { %136 = vlog2.f32 %v96_v2 }
   0x5   :  { %138 = vlog2.f32 %v97_v3 }
   0xc   :  { %v133_v4 = vpop.eup %132 }
   0xd   :  { %v135_v5 = vpop.eup %134  ;;  %v91_v6 = vmul.f32 0.6931472, %v133_v4 }
   0xe   :  { %v137_v7 = vpop.eup %136  ;;  %v93_v8 = vmul.f32 0.6931472, %v135_v5 }
   0xf   :  { %v139_v9 = vpop.eup %138  ;;  %v94_v10 = vmax.f32 %v91_v6, -100.0  ;;  %v99_v11 = vmul.f32 0.6931472, %v137_v7 }
  0x10   :  { %v95_v12 = vmax.f32 %v93_v8, -100.0  ;;  %v101_v13 = vmul.f32 0.6931472, %v139_v9 }
  0x11   :  { %v102_v14 = vmax.f32 %v99_v11, -100.0 }
  0x12   :  { %v103_v16 = vmax.f32 %v101_v13, -100.0 }
  0x13   :  { %v104_v18 = vsub.f32 %v94_v10, %v102_v14 }
  0x14   :  { %v105_v19 = vsub.f32 %v95_v12, %v103_v16 }
  0x15   :  { %v106_v20 = vmul.f32 %v104_v18, %v88_v15 }
  0x16   :  { %v107_v21 = vmul.f32 %v105_v19, %v89_v17 }
  0x17   :  { %v108_v22 = vadd.f32 %v106_v20, %v102_v14 }
  0x18   :  { %v109_v23 = vadd.f32 %v107_v21, %v103_v16 }
  0x19   :  { %v110_v24 = vsub.f32 0.0, %v108_v22 }
  0x1a   :  { %v111_v25 = vsub.f32 0.0, %v109_v23 }
  0x1c   :  { %v112_v26 = vadd.f32 %v111_v25, %v110_v24 }
  0x1e   :  { %114 = vst [vmem:[%s172_s2] sm:$0xff] %v112_v26 }

</bundles_post_ra>
